<compile_context>
chip_gen: v5e
topology: v5e:2x2
jax: 0.10.0
libtpu: 0.0.40
codegen_flags: <defaults>
</compile_context>

<pallas_src>
import jax
import jax.numpy as jnp
from jax.experimental import pallas as pl
from jax.experimental.pallas import tpu as pltpu

LANE = 128
BATCH_ALIGN = 16     # bf16 sublane packing: keep batch block dim a multiple of 16
TB_MAX = 512         # mem-bound sweet spot (~85% of HBM roofline)


def _round_up(x, m):
    return ((x + m - 1) // m) * m


def _sarcasm_kernel(x_ref, w1_ref, b1_ref, w2_ref, b2_ref, out_ref):
    f32 = jnp.float32
    # Stage 1: all five modality linears in one bf16 MXU pass (block-diag W1),
    # f32 accumulate; bias add + ReLU on the f32 accumulator.
    h = jnp.dot(x_ref[...], w1_ref[...], preferred_element_type=f32)
    h = jnp.maximum(h + b1_ref[...], 0.0)
    # Stage 2: final_fc over the (already concatenated) hidden in one dot.
    # W2 is stored bf16 purely to halve its DMA; up-cast in-register and keep
    # the matmul/elementwise path f32 (kernel is HBM-bound, MXU rate is moot).
    out = jnp.dot(h, w2_ref[...].astype(f32), preferred_element_type=f32)
    out = out + b2_ref[...]
    out_ref[...] = out.astype(out_ref.dtype)


def init_params(key, text_dim, audio_dim, video_dim, context_dim,
                hidden_dim, output_dim):
    """Deterministic synthetic params. Weights stored as (in_dim, out_dim)."""
    keys = jax.random.split(key, 10)

    def w(k, din, dout):
        return jax.random.uniform(k, (din, dout), jnp.float32,
                                  minval=-0.1, maxval=0.1)

    def b(k, dout):
        return jax.random.uniform(k, (1, dout), jnp.float32,
                                  minval=-0.1, maxval=0.1)

    H = hidden_dim
    return {
        "wt": w(keys[0], text_dim, H),       "bt": b(keys[1], H),
        "wc": w(keys[2], context_dim, H),    "bc": b(keys[3], H),
        "wa": w(keys[4], audio_dim, H),      "ba": b(keys[5], H),
        "wv": w(keys[6], video_dim, H),      "bv": b(keys[7], H),
        "wf": w(keys[8], 5 * H, output_dim), "bf": b(keys[9], output_dim),
    }


def pack_params(params, dims, hidden_dim, output_dim):
    """Offline packing: bf16 weight slabs + f32 bias rows (exact block-diag fusion)."""
    text_dim, context_dim, audio_dim, video_dim = dims
    H = hidden_dim
    in_dims = (text_dim, context_dim, audio_dim, video_dim, video_dim)
    in_total = sum(in_dims)
    in_pad = _round_up(in_total, LANE)
    out_pad = _round_up(output_dim, LANE)

    # Block-diagonal first-stage weight; concat order [t, c, a, uv, cv];
    # the single video_fc weight is shared by both video streams (as in the module).
    w_blocks = (params["wt"], params["wc"], params["wa"],
                params["wv"], params["wv"])
    w1 = jnp.zeros((in_pad, 5 * H), jnp.float32)
    row = 0
    for k, (d, wb) in enumerate(zip(in_dims, w_blocks)):
        w1 = w1.at[row:row + d, k * H:(k + 1) * H].set(wb.astype(jnp.float32))
        row += d
    b1 = jnp.concatenate(
        [params["bt"], params["bc"], params["ba"], params["bv"], params["bv"]],
        axis=-1).astype(jnp.float32)

    # Final weight / bias, lane-padded so the kernel's output store is lane-dense.
    w2 = jnp.zeros((5 * H, out_pad), jnp.float32).at[:, :output_dim].set(
        params["wf"].astype(jnp.float32))
    b2 = jnp.zeros((1, out_pad), jnp.float32).at[:, :output_dim].set(
        params["bf"].astype(jnp.float32))

    return {"w1": w1.astype(jnp.bfloat16), "b1": b1,
            "w2": w2.astype(jnp.bfloat16), "b2": b2,
            "in_pad": in_pad, "out_pad": out_pad, "output_dim": output_dim}


def _pick_batch_tile(B):
    if B <= 256:
        # Single grid step, zero dead-row DMA for small/mid batches.
        return _round_up(B, BATCH_ALIGN)
    if B <= 2 * TB_MAX:
        # >=2 grid steps so the "parallel" batch axis shards across v7x's 2 TCs.
        return _round_up(pl.cdiv(B, 2), BATCH_ALIGN)
    # Very large B: 512-row tiles, many steps.
    return TB_MAX


def multimodal_sarcasm_forward(text, context, audio, utterance_video,
                               context_video, packed):
    f32, bf16 = jnp.float32, jnp.bfloat16
    # Conditional seq-mean (as in the module) hoisted out of the kernel.
    if audio.ndim > 2:
        audio = jnp.mean(audio.astype(f32), axis=1)
    # Layout plumbing: one bf16 lane-dense activation slab for the block-diag
    # matmul.  (Callers that already hold a pre-concatenated (B, 128) slab can
    # skip this concat; under jit the 5 casts + concat + pad fuse into one pass.)
    x = jnp.concatenate(
        [text.astype(bf16), context.astype(bf16), audio.astype(bf16),
         utterance_video.astype(bf16), context_video.astype(bf16)], axis=-1)

    B, in_total = x.shape
    in_pad, out_pad = packed["in_pad"], packed["out_pad"]
    if in_total < in_pad:
        x = jnp.pad(x, ((0, 0), (0, in_pad - in_total)))

    tb = _pick_batch_tile(B)
    Bp = _round_up(B, tb)
    if Bp != B:
        x = jnp.pad(x, ((0, Bp - B), (0, 0)))

    w1, b1, w2, b2 = packed["w1"], packed["b1"], packed["w2"], packed["b2"]
    H5 = w1.shape[1]

    flops = 2 * Bp * (in_pad * H5 + H5 * out_pad)
    bytes_accessed = (Bp * in_pad * 2                 # x slab (bf16)
                      + in_pad * H5 * 2 + H5 * 4      # W1 (bf16) + b1 (f32)
                      + H5 * out_pad * 2 + out_pad * 4  # W2 (bf16) + b2 (f32)
                      + Bp * out_pad * 2)             # output (bf16)

    out = pl.pallas_call(
        _sarcasm_kernel,
        out_shape=jax.ShapeDtypeStruct((Bp, out_pad), bf16),
        grid_spec=pltpu.PrefetchScalarGridSpec(
            num_scalar_prefetch=0,
            grid=(Bp // tb,),
            in_specs=[
                pl.BlockSpec((tb, in_pad), lambda i: (i, 0)),     # activations
                pl.BlockSpec((in_pad, H5), lambda i: (0, 0)),     # W1 (resident)
                pl.BlockSpec((1, H5), lambda i: (0, 0)),          # b1
                pl.BlockSpec((H5, out_pad), lambda i: (0, 0)),    # W2 (resident)
                pl.BlockSpec((1, out_pad), lambda i: (0, 0)),     # b2
            ],
            out_specs=pl.BlockSpec((tb, out_pad), lambda i: (i, 0)),
        ),
        compiler_params=pltpu.CompilerParams(
            dimension_semantics=("parallel",)),
        cost_estimate=pl.CostEstimate(
            flops=flops, transcendentals=0, bytes_accessed=bytes_accessed),
    )(x, w1, b1, w2, b2)

    # Slice off batch/lane padding; return f32 like the PyTorch module.
    return out[:B, :packed["output_dim"]].astype(f32)


def reference_forward(text, context, audio, uv, cv, params):
    """Plain-JAX f32 reference mirroring the PyTorch module."""
    f32 = jnp.float32
    relu = lambda v: jnp.maximum(v, 0.0)
    t = relu(text.astype(f32) @ params["wt"] + params["bt"])
    c = relu(context.astype(f32) @ params["wc"] + params["bc"])
    a_in = jnp.mean(audio.astype(f32), axis=1) if audio.ndim > 2 else audio.astype(f32)
    a = relu(a_in @ params["wa"] + params["ba"])
    u = relu(uv.astype(f32) @ params["wv"] + params["bv"])
    v = relu(cv.astype(f32) @ params["wv"] + params["bv"])
    combined = jnp.concatenate([t, c, a, u, v], axis=-1)
    return combined @ params["wf"] + params["bf"]


if __name__ == "__main__":
    # Small shapes consistent with the module's forward.
    B = 2
    text_dim, context_dim, audio_dim, video_dim = 32, 32, 24, 20
    hidden_dim, output_dim = 32, 2
    audio_seq = 5

    key = jax.random.PRNGKey(0)
    k_in, k_p = jax.random.split(key)
    ks = jax.random.split(k_in, 5)

    text = jax.random.normal(ks[0], (B, text_dim), jnp.float32)
    context = jax.random.normal(ks[1], (B, context_dim), jnp.float32)
    audio = jax.random.normal(ks[2], (B, audio_seq, audio_dim), jnp.float32)
    utterance_video = jax.random.normal(ks[3], (B, video_dim), jnp.float32)
    context_video = jax.random.normal(ks[4], (B, video_dim), jnp.float32)

    params = init_params(k_p, text_dim, audio_dim, video_dim, context_dim,
                         hidden_dim, output_dim)
    packed = pack_params(params, (text_dim, context_dim, audio_dim, video_dim),
                         hidden_dim, output_dim)

    # jit the whole forward so the mean/concat/pad and the output slice fuse
    # around the pallas_call (the CostEstimate helps XLA schedule them).
    fwd = jax.jit(lambda t, c, a, u, v:
                  multimodal_sarcasm_forward(t, c, a, u, v, packed))

    out = fwd(text, context, audio, utterance_video, context_video)
    out = jax.block_until_ready(out)

    ref = reference_forward(text, context, audio, utterance_video,
                            context_video, params)
    assert out.shape == (B, output_dim), out.shape
    # bf16 weights/activations/output vs f32 reference -> loosened tolerance.
    assert jnp.allclose(out, ref, atol=3e-2, rtol=3e-2), float(
        jnp.max(jnp.abs(out - ref)))

    print("KERNEL_OK")
</pallas_src>

<mosaic_0001>
module attributes {stable_mosaic.version = 11 : i64} {
  func.func @_sarcasm_kernel(%arg0: i32, %arg1: memref<16x128xbf16, #tpu.memory_space<vmem>>, %arg2: memref<128x160xbf16, #tpu.memory_space<vmem>>, %arg3: memref<1x160xf32, #tpu.memory_space<vmem>>, %arg4: memref<160x128xbf16, #tpu.memory_space<vmem>>, %arg5: memref<1x128xf32, #tpu.memory_space<vmem>>, %arg6: memref<16x128xbf16, #tpu.memory_space<vmem>>) attributes {dimension_semantics = [#tpu.dimension_semantics<parallel>], iteration_bounds = array<i64: 1>, scalar_prefetch = 0 : i64, scratch_operands = 0 : i64, tpu.core_type = #tpu.core_type<tc>, window_params = [{transform_indices = @transform_0, window_bounds = array<i64: 16, 128>}, {pipeline_mode = #tpu.pipeline_mode<synchronous>, transform_indices = @transform_1, window_bounds = array<i64: 128, 160>}, {pipeline_mode = #tpu.pipeline_mode<synchronous>, transform_indices = @transform_2, window_bounds = array<i64: 1, 160>}, {pipeline_mode = #tpu.pipeline_mode<synchronous>, transform_indices = @transform_3, window_bounds = array<i64: 160, 128>}, {pipeline_mode = #tpu.pipeline_mode<synchronous>, transform_indices = @transform_4, window_bounds = array<i64: 1, 128>}, {transform_indices = @transform_5, window_bounds = array<i64: 16, 128>}]} {
    %c0 = arith.constant 0 : index
    %c0_0 = arith.constant 0 : index
    %0 = vector.load %arg1[%c0, %c0_0] : memref<16x128xbf16, #tpu.memory_space<vmem>>, vector<16x128xbf16>
    %c0_1 = arith.constant 0 : index
    %c0_2 = arith.constant 0 : index
    %1 = vector.load %arg2[%c0_1, %c0_2] : memref<128x160xbf16, #tpu.memory_space<vmem>>, vector<128x160xbf16>
    %cst = arith.constant dense<0.000000e+00> : vector<16x160xf32>
    %2 = tpu.matmul %0, %1, %cst {dimension_numbers = #tpu.dot_dimension_numbers<[1], [0], [0], [1], [0, 0, 1, 1], [], []>} : vector<16x128xbf16>, vector<128x160xbf16>, vector<16x160xf32> -> vector<16x160xf32>
    %c0_3 = arith.constant 0 : index
    %c0_4 = arith.constant 0 : index
    %3 = vector.load %arg3[%c0_3, %c0_4] : memref<1x160xf32, #tpu.memory_space<vmem>>, vector<1x160xf32>
    %4 = vector.broadcast %3 : vector<1x160xf32> to vector<16x160xf32>
    %5 = arith.addf %2, %4 : vector<16x160xf32>
    %cst_5 = arith.constant 0.000000e+00 : f32
    %6 = vector.broadcast %cst_5 : f32 to vector<16x160xf32>
    %7 = arith.maximumf %5, %6 : vector<16x160xf32>
    %c0_6 = arith.constant 0 : index
    %c0_7 = arith.constant 0 : index
    %8 = vector.load %arg4[%c0_6, %c0_7] : memref<160x128xbf16, #tpu.memory_space<vmem>>, vector<160x128xbf16>
    %9 = arith.extf %8 : vector<160x128xbf16> to vector<160x128xf32>
    %cst_8 = arith.constant dense<0.000000e+00> : vector<16x128xf32>
    %10 = tpu.matmul %7, %9, %cst_8 {dimension_numbers = #tpu.dot_dimension_numbers<[1], [0], [0], [1], [0, 0, 1, 1], [], []>} : vector<16x160xf32>, vector<160x128xf32>, vector<16x128xf32> -> vector<16x128xf32>
    %c0_9 = arith.constant 0 : index
    %c0_10 = arith.constant 0 : index
    %11 = vector.load %arg5[%c0_9, %c0_10] : memref<1x128xf32, #tpu.memory_space<vmem>>, vector<1x128xf32>
    %12 = vector.broadcast %11 : vector<1x128xf32> to vector<16x128xf32>
    %13 = arith.addf %10, %12 : vector<16x128xf32>
    %14 = arith.truncf %13 : vector<16x128xf32> to vector<16x128xbf16>
    %c0_11 = arith.constant 0 : index
    %c0_12 = arith.constant 0 : index
    %15 = vector.load %arg6[%c0_11, %c0_12] : memref<16x128xbf16, #tpu.memory_space<vmem>>, vector<16x128xbf16>
    tpu.vector_store %arg6[%c0_11, %c0_12], %14 {strides = array<i32>} : memref<16x128xbf16, #tpu.memory_space<vmem>>, vector<16x128xbf16>,
    return
  }
  func.func @transform_0(%arg0: i32) -> (i32, i32) {
    %c0_i32 = arith.constant 0 : i32
    %c0_i32_0 = arith.constant 0 : i32
    return %arg0, %c0_i32 : i32, i32
  }
  func.func @transform_1(%arg0: i32) -> (i32, i32) {
    %c0_i32 = arith.constant 0 : i32
    %c0_i32_0 = arith.constant 0 : i32
    %c0_i32_1 = arith.constant 0 : i32
    return %c0_i32, %c0_i32_0 : i32, i32
  }
  func.func @transform_2(%arg0: i32) -> (i32, i32) {
    %c0_i32 = arith.constant 0 : i32
    %c0_i32_0 = arith.constant 0 : i32
    %c0_i32_1 = arith.constant 0 : i32
    return %c0_i32, %c0_i32_0 : i32, i32
  }
  func.func @transform_3(%arg0: i32) -> (i32, i32) {
    %c0_i32 = arith.constant 0 : i32
    %c0_i32_0 = arith.constant 0 : i32
    %c0_i32_1 = arith.constant 0 : i32
    return %c0_i32, %c0_i32_0 : i32, i32
  }
  func.func @transform_4(%arg0: i32) -> (i32, i32) {
    %c0_i32 = arith.constant 0 : i32
    %c0_i32_0 = arith.constant 0 : i32
    %c0_i32_1 = arith.constant 0 : i32
    return %c0_i32, %c0_i32_0 : i32, i32
  }
  func.func @transform_5(%arg0: i32) -> (i32, i32) {
    %c0_i32 = arith.constant 0 : i32
    %c0_i32_0 = arith.constant 0 : i32
    return %arg0, %c0_i32 : i32, i32
  }
}

</mosaic_0001>

<bundles_post_ra>
// kernel: _lambda_.1
= control target key start
LH: loop header
LB: loop body
LE: loop exit
PB: predicated region body
PF: predicated region fallthrough
CT: control target
= control target key end

     0   :  { %10 = vsyncpa [#allocation3], 0  ;;  %s559_s0 = inlined_call_operand.vmem [shape: bf16[16,128], index: 0, kind: input, shape index: {}]   ;;  %s560_s1 = inlined_call_operand.hbm [shape: bf16[128,160], index: 1, kind: input, shape index: {}]   ;;  %s561_s2 = inlined_call_operand.vmem [shape: f32[1,160], index: 2, kind: input, shape index: {}]   ;;  %s562_s3 = inlined_call_operand.hbm [shape: bf16[160,128], index: 3, kind: input, shape index: {}]   ;;  %s563_s4 = inlined_call_operand.vmem [shape: f32[1,128], index: 4, kind: input, shape index: {}]   ;;  %s564_s5 = inlined_call_operand.vmem [shape: bf16[16,128], index: 5, kind: output, shape index: {}]  }
   0x1   :  { %s18_s20 = sshll.u32 %s560_s1, 4  ;;  %s19_s20 = int_to_ptr.hbm [resolvable:$true] %s18_s20 }
   0x2   :  { %11 = vsyncpa [#allocation5], 0  ;;  %s501_s21 = smov [#allocation2]   ;;  %s33_s25 = sshll.u32 %s562_s3, 4  ;;  %s34_s25 = int_to_ptr.hbm [resolvable:$true] %s33_s25 }
   0x3   :  { %s20_s22 = sshll.u32 %s501_s21, 4  ;;  %s502_s26 = smov 128   ;;  %s21_s22 = int_to_ptr.vmem [resolvable:$true] %s20_s22 }
   0x4   :  { %s503_s27 = smov 8   ;;  %s504_s28 = smov [#allocation4]  }
   0x5   :  { %26 = dma.hbm_to_vmem [thread:$0]  %s19_s20, 2048, %s21_s22, [#allocation3], %s502_s26, %s502_s26, %s503_s27  }
   0x6   :  { %s35_s29 = sshll.u32 %s504_s28, 4  ;;  %s505_s30 = smov 64   ;;  %s36_s29 = int_to_ptr.vmem [resolvable:$true] %s35_s29 }
   0x7   :  { %s506_s6 = smov 4  }
   0x8   :  { %41 = dma.hbm_to_vmem [thread:$0]  %s34_s25, 1280, %s36_s29, [#allocation5], %s505_s30, %s505_s30, %s506_s6  }
   0x9   :  { %497 = dma.done.wait [#allocation3], 2048  }
   0xa   :  { %498 = vsyncadd [#allocation3], 4294965248 }
   0xb   :  { %499 = dma.done.wait [#allocation5], 1280  }
   0xc   :  { %500 = vsyncadd [#allocation5], 4294966016  ;;  %v363_v0 = vld [vmem:[#allocation2 + $0x70] sm:$0xf]  ;;  %v387_v1 = vld [vmem:[#allocation2 + $0x74] sm:$0xf0] }
   0xd   :  { %v386_v2 = vld [vmem:[#allocation2 + $0x74] sm:$0xf]  ;;  %v364_v3 = vor.u32 %v387_v1, %v363_v0  ;;  %v365_v4 = vld [vmem:[#allocation2 + $0x78] sm:$0xf0]  ;;  %v355_v5 = vld [vmem:[#allocation2 + $0x60] sm:$0xf] }
   0xe   :  { %v385_v6 = vld [vmem:[#allocation2 + $0x64] sm:$0xf0]  ;;  %v368_v7 = vor.u32 %v386_v2, %v365_v4  ;;  %v384_v8 = vld [vmem:[#allocation2 + $0x64] sm:$0xf]  ;;  %v357_v9 = vld [vmem:[#allocation2 + $0x68] sm:$0xf0] }
   0xf   :  { %162 = vmatpush.bf16.msra.mxu0 %v364_v3  ;;  %v356_v10 = vor.u32 %v385_v6, %v355_v5  ;;  %v360_v11 = vor.u32 %v384_v8, %v357_v9  ;;  %v347_v12 = vld [vmem:[#allocation2 + $0x50] sm:$0xf]  ;;  %v383_v13 = vld [vmem:[#allocation2 + $0x54] sm:$0xf0]  ;;  %v382_v14 = vld [vmem:[#allocation2 + $0x54] sm:$0xf] }
  0x10   :  { %176 = vmatpush.bf16.msra.mxu1 %v368_v7  ;;  %v349_v15 = vld [vmem:[#allocation2 + $0x58] sm:$0xf0]  ;;  %v348_v16 = vor.u32 %v383_v13, %v347_v12  ;;  %v339_v18 = vld [vmem:[#allocation2 + $0x40] sm:$0xf]  ;;  %v381_v19 = vld [vmem:[#allocation2 + $0x44] sm:$0xf0] }
  0x11   :  { %v352_v17 = vor.u32 %v382_v14, %v349_v15  ;;  %v380_v20 = vld [vmem:[#allocation2 + $0x44] sm:$0xf]  ;;  %v341_v21 = vld [vmem:[#allocation2 + $0x48] sm:$0xf0]  ;;  %v340_v22 = vor.u32 %v381_v19, %v339_v18  ;;  %v439_v23 = vld [vmem:[#allocation4 + $0x38] sm:$0xff]   ;;  %vm238_vm0 = vcmask 261120  }
  0x12   :  { %v438_v24 = vld [vmem:[#allocation4 + $0x30] sm:$0xff]   ;;  %v344_v25 = vor.u32 %v380_v20, %v341_v21  ;;  %v379_v27 = vld [vmem:[#allocation2 + $0x34] sm:$0xf0]  ;;  %v419_v28 = vunpack.c.h.bf16 %v439_v23  ;;  %v418_v29 = vunpack.c.l.bf16 %v439_v23  ;;  %v333_v31 = vld [vmem:[#allocation2 + $0x38] sm:$0xf0] }
  0x13   :  { %163 = vmatpush.bf16.msra.mxu0 %v356_v10  ;;  %v331_v26 = vld [vmem:[#allocation2 + $0x30] sm:$0xf]  ;;  %v378_v30 = vld [vmem:[#allocation2 + $0x34] sm:$0xf]  ;;  %v543_v32 = vld [vmem:[#allocation4 + $0x48] sm:$0xff]   ;;  %v415_v33 = vunpack.c.h.bf16 %v438_v24  ;;  %v414_v40 = vunpack.c.l.bf16 %v438_v24 }
  0x14   :  { %177 = vmatpush.bf16.msra.mxu1 %v360_v11  ;;  %245 = vmatpush.msra.mxu2 %v419_v28  ;;  %v332_v34 = vor.u32 %v379_v27, %v331_v26  ;;  %v437_v35 = vld [vmem:[#allocation4 + $0x28] sm:$0xff]   ;;  %v427_v36 = vunpack.c.h.bf16 %v543_v32  ;;  %v336_v37 = vor.u32 %v378_v30, %v333_v31  ;;  %v323_v38 = vld [vmem:[#allocation2 + $0x20] sm:$0xf]  ;;  %v376_v41 = vld [vmem:[#allocation2 + $0x24] sm:$0xf]  ;;  %v426_v8 = vunpack.c.l.bf16 %v543_v32 }
  0x15   :  { %v377_v39 = vld [vmem:[#allocation2 + $0x24] sm:$0xf0]  ;;  %v325_v42 = vld [vmem:[#allocation2 + $0x28] sm:$0xf0]  ;;  %v411_v43 = vunpack.c.h.bf16 %v437_v35  ;;  %v436_v45 = vld [vmem:[#allocation4 + $0x20] sm:$0xff]   ;;  %v410_v49 = vunpack.c.l.bf16 %v437_v35 }
  0x16   :  { %246 = vmatpush.msra.mxu2 %v418_v29  ;;  %280 = vmatpush.msra.mxu3 %v427_v36  ;;  %v324_v44 = vor.u32 %v377_v39, %v323_v38  ;;  %v328_v46 = vor.u32 %v376_v41, %v325_v42  ;;  %v315_v47 = vld [vmem:[#allocation2 + $0x10] sm:$0xf]  ;;  %v375_v48 = vld [vmem:[#allocation2 + $0x14] sm:$0xf0]  ;;  %v374_v50 = vld [vmem:[#allocation2 + $0x14] sm:$0xf]  ;;  %v407_v52 = vunpack.c.h.bf16 %v436_v45  ;;  %v406_v58 = vunpack.c.l.bf16 %v436_v45 }
  0x17   :  { %164 = vmatpush.bf16.msra.mxu0 %v348_v16  ;;  %v317_v51 = vld [vmem:[#allocation2 + $0x18] sm:$0xf0]  ;;  %v316_v53 = vor.u32 %v375_v48, %v315_v47  ;;  %v307_v56 = vld [vmem:[#allocation2] sm:$0xf]  ;;  %v373_v57 = vld [vmem:[#allocation2 + $0x4] sm:$0xf0] }
  0x18   :  { %178 = vmatpush.bf16.msra.mxu1 %v352_v17  ;;  %247 = vmatpush.msra.mxu2 %v415_v33  ;;  %v435_v54 = vld [vmem:[#allocation4 + $0x18] sm:$0xff]   ;;  %v320_v55 = vor.u32 %v374_v50, %v317_v51  ;;  %v372_v59 = vld [vmem:[#allocation2 + $0x4] sm:$0xf]  ;;  %v309_v60 = vld [vmem:[#allocation2 + $0x8] sm:$0xf0]  ;;  %v308_v62 = vor.u32 %v373_v57, %v307_v56 }
  0x19   :  { %v403_v61 = vunpack.c.h.bf16 %v435_v54  ;;  %v434_v63 = vld [vmem:[#allocation4 + $0x10] sm:$0xff]   ;;  %v312_v0 = vor.u32 %v372_v59, %v309_v60  ;;  %v402_v1 = vunpack.c.l.bf16 %v435_v54  ;;  %v371_v2 = vld [vmem:[%s559_s0] sm:$0xff]  ;;  %v433_v4 = vld [vmem:[#allocation4 + $0x8] sm:$0xff]   ;;  %281 = vmatpush.msra.mxu3 %v426_v8 }
  0x1a   :  { %248 = vmatpush.msra.mxu2 %v414_v40  ;;  %v399_v3 = vunpack.c.h.bf16 %v434_v63  ;;  %v398_v5 = vunpack.c.l.bf16 %v434_v63  ;;  %v395_v6 = vunpack.c.h.bf16 %v433_v4  ;;  %v394_v7 = vunpack.c.l.bf16 %v433_v4  ;;  %v389_v9 = vld [vmem:[#allocation4] sm:$0xff]  }
  0x1b   :  { %165 = vmatpush.bf16.msra.mxu0 %v340_v22  ;;  %v440_v10 = vld [vmem:[#allocation4 + $0x40] sm:$0xff]   ;;  %v391_v11 = vunpack.c.h.bf16 %v389_v9  ;;  %v390_v13 = vunpack.c.l.bf16 %v389_v9 }
  0x1c   :  { %179 = vmatpush.bf16.msra.mxu1 %v344_v25  ;;  %249 = vmatpush.msra.mxu2 %v411_v43  ;;  %v423_v12 = vunpack.c.h.bf16 %v440_v10  ;;  %v422_v14 = vunpack.c.l.bf16 %v440_v10  ;;  %v70_v15 = vld [vmem:[%s561_s2] sm:$0x3] }
  0x1d   :  { %v72_v16 = vperm.slane %v70_v15, 0  ;;  %v73_v17 = vperm.slane %v70_v15, 1  ;;  %v448_v32 = vld [vmem:[%s563_s4] ss:$0 sm:$0xff] }
  0x1e   :  { %250 = vmatpush.msra.mxu2 %v410_v49  ;;  %282 = vmatpush.msra.mxu3 %v423_v12 }
  0x1f   :  { %166 = vmatpush.bf16.msra.mxu0 %v332_v34 }
  0x20   :  { %180 = vmatpush.bf16.msra.mxu1 %v336_v37  ;;  %251 = vmatpush.msra.mxu2 %v407_v52 }
  0x21   :  { %283 = vmatpush.msra.mxu3 %v422_v14 }
  0x22   :  { %252 = vmatpush.msra.mxu2 %v406_v58 }
  0x23   :  { %167 = vmatpush.bf16.msra.mxu0 %v324_v44 }
  0x24   :  { %181 = vmatpush.bf16.msra.mxu1 %v328_v46  ;;  %253 = vmatpush.msra.mxu2 %v403_v61 }
  0x26   :  { %254 = vmatpush.msra.mxu2 %v402_v1 }
  0x27   :  { %168 = vmatpush.bf16.msra.mxu0 %v316_v53 }
  0x28   :  { %182 = vmatpush.bf16.msra.mxu1 %v320_v55  ;;  %255 = vmatpush.msra.mxu2 %v399_v3 }
  0x2a   :  { %256 = vmatpush.msra.mxu2 %v398_v5 }
  0x2b   :  { %169 = vmatpush.bf16.msra.mxu0 %v308_v62 }
  0x2c   :  { %183 = vmatpush.bf16.msra.mxu1 %v312_v0  ;;  %257 = vmatpush.msra.mxu2 %v395_v6 }
  0x2e   :  { %170 = vmatmul.bf16.vlgmr.msra.gmra.mxu0 %v371_v2  ;;  %258 = vmatpush.msra.mxu2 %v394_v7 }
  0x2f   :  { %184 = vmatmul.bf16.vlgmr.msra.gmra.mxu1 %v371_v2 }
  0x30   :  { %259 = vmatpush.msra.mxu2 %v391_v11 }
  0x32   :  { %260 = vmatpush.msra.mxu2 %v390_v13 }
  0xab   :  { %v171_v18 = vpop.f32.mrf.mxu0 }
  0xac   :  { %v172_v19 = vadd.f32 %v171_v18, %v72_v16  ;;  %v185_v20 = vpop.f32.mrf.mxu1 }
  0xad   :  { %v186_v21 = vadd.f32 %v185_v20, %v73_v17 }
  0xae   :  { %v190_v22 = vmax.f32 %v172_v19, 0.0 }
  0xaf   :  { %v191_v23 = vmax.f32 %v186_v21, 0.0 }
  0xb0   :  { %261 = vmatmul.f32.vlgmr.msra.gmra.mxu2 %v190_v22 }
  0xb1   :  { %369 = vmatmul.msk.f32.vlgmr.msra.gmra.mxu3 %vm238_vm0, %v191_v23 }
  0xb3   :  { %v173_v24 = vpop.f32.mrf.mxu0 }
  0xb4   :  { %v174_v25 = vadd.f32 %v173_v24, %v72_v16  ;;  %v187_v26 = vpop.f32.mrf.mxu1 }
  0xb5   :  { %v188_v27 = vadd.f32 %v187_v26, %v73_v17 }
  0xb6   :  { %v192_v28 = vmax.f32 %v174_v25, 0.0 }
  0xb7   :  { %v193_v29 = vmax.f32 %v188_v27, 0.0 }
  0xb8   :  { %264 = vmatmul.f32.gmra.mxu2 %v192_v28 }
  0xb9   :  { %370 = vmatmul.msk.f32.gmra.mxu3 %vm238_vm0, %v193_v29 }
 0x133   :  { %v262_v30 = vpop.f32.mrf.mxu2 }
 0x134   :  { %v285_v31 = vpop.f32.mrf.mxu3  ;;  %v263_v33 = vadd.f32 %v448_v32, %v262_v30 }
 0x136   :  { %v286_v37 = vadd.f32 %v285_v31, %v263_v33 }
 0x13b   :  { %v265_v34 = vpop.f32.mrf.mxu2 }
 0x13c   :  { %v266_v35 = vadd.f32 %v448_v32, %v265_v34  ;;  %v288_v36 = vpop.f32.mrf.mxu3 }
 0x13e   :  { %v289_v38 = vadd.f32 %v288_v36, %v266_v35 }
 0x140   :  { %v431_v39 = vpack.c.bf16 %v289_v38, %v286_v37 }
 0x142   :  { %432 = vst [vmem:[%s564_s5] sm:$0xff] %v431_v39  }
 0x143   :  { %299 = vsyncpa [#allocation3], 1 }
 0x144   :  { %300 = vsyncpa [#allocation5], 1 }

</bundles_post_ra>
